<compile_context>
chip_gen: v6e
topology: v6e:2x2x1
jax: 0.10.0
libtpu: 0.0.40
codegen_flags: <defaults>
</compile_context>

<pallas_src>
import jax
import jax.numpy as jnp
from jax.experimental import pallas as pl
from jax.experimental.pallas import tpu as pltpu


LANES = 128
_TARGET_BLOCK_BYTES = 4 * 1024 * 1024   # ~4 MiB per block (safe on v5e/v6e/v7x)
_VMEM_LIMIT_BYTES = 32 * 1024 * 1024    # fits double-buffered in+out everywhere
_MIN_KERNEL_ELEMS = 1 << 20             # below this, fused XLA op wins


def _bic_kernel(params_ref, x_ref, o_ref):
    # params_ref lives in SMEM: [alpha, beta] as f32 scalars.
    alpha = params_ref[0]
    beta = params_ref[1]
    x = x_ref[...]
    y = alpha * x.astype(jnp.float32) + beta
    o_ref[...] = y.astype(o_ref.dtype)


def _bic_pallas_2d(x2d, params):
    rows, cols = x2d.shape
    itemsize = jnp.dtype(x2d.dtype).itemsize
    n = rows * cols

    # Pick block rows so one block is ~4 MiB (rounded to a multiple of 8 for
    # the (8, 128) tiling constraint). Partial last blocks are masked by Pallas.
    target_rows = max(8, _TARGET_BLOCK_BYTES // (cols * itemsize))
    if rows <= target_rows:
        block_rows = rows                       # single block along rows
    else:
        block_rows = max(8, (target_rows // 8) * 8)

    grid = (pl.cdiv(rows, block_rows),)

    return pl.pallas_call(
        _bic_kernel,
        out_shape=jax.ShapeDtypeStruct((rows, cols), x2d.dtype),
        grid_spec=pltpu.PrefetchScalarGridSpec(
            num_scalar_prefetch=0,
            grid=grid,
            in_specs=[
                pl.BlockSpec(memory_space=pltpu.MemorySpace.SMEM),   # [alpha, beta]
                pl.BlockSpec((block_rows, cols), lambda i: (i, 0)),
            ],
            out_specs=pl.BlockSpec((block_rows, cols), lambda i: (i, 0)),
        ),
        compiler_params=pltpu.CompilerParams(
            dimension_semantics=("parallel",),      # megacore-shard grid on v7x
            vmem_limit_bytes=_VMEM_LIMIT_BYTES,
        ),
        cost_estimate=pl.CostEstimate(
            flops=2 * n,
            transcendentals=0,
            bytes_accessed=2 * n * itemsize,
        ),
    )(params, x2d)


def bic_forward(x, alpha, beta, *, min_kernel_elems=_MIN_KERNEL_ELEMS):
    """y = alpha * x + beta with scalar (shape-(1,)) parameters."""
    alpha32 = jnp.asarray(alpha, jnp.float32).reshape(())
    beta32 = jnp.asarray(beta, jnp.float32).reshape(())
    n = x.size

    # Fallback: tiny tensors (kernel launch overhead dominates) or flat lengths
    # not divisible by 128 lanes (padding would add extra full HBM passes while
    # XLA's fused elementwise is already a single pass at roofline).
    if n == 0 or n < min_kernel_elems or n % LANES != 0:
        y = alpha32 * x.astype(jnp.float32) + beta32
        return y.astype(x.dtype)

    # Widest lane-dense last dim that divides n exactly (reshape is free).
    for cols in (2048, 1024, 512, 256, 128):
        if n % cols == 0:
            break
    x2d = x.reshape(n // cols, cols)

    params = jnp.stack([alpha32, beta32])        # f32 (2,) -> SMEM
    out2d = _bic_pallas_2d(x2d, params)
    return out2d.reshape(x.shape)


class BiCLayer:
    """JAX mirror of the PyTorch BiCLayer (scalar affine bias correction)."""

    def __init__(self, init_zero=False):
        if init_zero:
            self.alpha = jnp.zeros((1,), dtype=jnp.float32)
            self.beta = jnp.zeros((1,), dtype=jnp.float32)
        else:
            self.alpha = jnp.ones((1,), dtype=jnp.float32)
            self.beta = jnp.zeros((1,), dtype=jnp.float32)

    def __call__(self, x):
        return bic_forward(x, self.alpha, self.beta)


if __name__ == "__main__":
    key = jax.random.PRNGKey(0)
    k1, k2 = jax.random.split(key)

    layer = BiCLayer(init_zero=False)
    layer.alpha = jnp.array([1.5], dtype=jnp.float32)
    layer.beta = jnp.array([-0.25], dtype=jnp.float32)

    # 1) Small NCHW input (the module's typical usage). Force the Pallas path
    #    so the kernel itself is exercised at this shape.
    x_small = jax.random.normal(k1, (2, 4, 16, 16), dtype=jnp.float32)
    y_small = jax.block_until_ready(
        bic_forward(x_small, layer.alpha, layer.beta, min_kernel_elems=0)
    )
    ref_small = layer.alpha[0] * x_small + layer.beta[0]
    assert y_small.shape == x_small.shape and y_small.dtype == x_small.dtype
    assert jnp.allclose(y_small, ref_small, atol=1e-6, rtol=1e-6)

    # 2) Layer call on the same input (tiny-tensor fast path, same semantics).
    y_layer = jax.block_until_ready(layer(x_small))
    assert jnp.allclose(y_layer, ref_small, atol=1e-6, rtol=1e-6)

    # 3) Larger input: exercises the multi-block pipelined kernel path
    #    (rows=1024, block=(512, 2048) f32 = 4 MiB, grid=(2,)).
    x_big = jax.random.normal(k2, (16, 32, 64, 64), dtype=jnp.float32)
    y_big = jax.block_until_ready(layer(x_big))
    ref_big = layer.alpha[0] * x_big + layer.beta[0]
    assert y_big.shape == x_big.shape and y_big.dtype == x_big.dtype
    assert jnp.allclose(y_big, ref_big, atol=1e-6, rtol=1e-6)

    print("KERNEL_OK")
</pallas_src>

<mosaic_0001>
module attributes {stable_mosaic.version = 11 : i64} {
  func.func @_bic_kernel(%arg0: i32, %arg1: memref<2xf32, #tpu.memory_space<smem>>, %arg2: memref<1x2048xf32, #tpu.memory_space<vmem>>, %arg3: memref<1x2048xf32, #tpu.memory_space<vmem>>) attributes {dimension_semantics = [#tpu.dimension_semantics<parallel>], iteration_bounds = array<i64: 1>, scalar_prefetch = 0 : i64, scratch_operands = 0 : i64, tpu.core_type = #tpu.core_type<tc>, window_params = [{transform_indices = @transform_0, window_bounds = array<i64: 2>}, {transform_indices = @transform_1, window_bounds = array<i64: 1, 2048>}, {transform_indices = @transform_2, window_bounds = array<i64: 1, 2048>}]} {
    %c0 = arith.constant 0 : index
    %0 = memref.load %arg1[%c0] : memref<2xf32, #tpu.memory_space<smem>>
    %c1 = arith.constant 1 : index
    %1 = memref.load %arg1[%c1] : memref<2xf32, #tpu.memory_space<smem>>
    %c0_0 = arith.constant 0 : index
    %c0_1 = arith.constant 0 : index
    %2 = vector.load %arg2[%c0_0, %c0_1] : memref<1x2048xf32, #tpu.memory_space<vmem>>, vector<1x2048xf32>
    %3 = vector.broadcast %0 : f32 to vector<1x2048xf32>
    %4 = arith.mulf %3, %2 : vector<1x2048xf32>
    %5 = vector.broadcast %1 : f32 to vector<1x2048xf32>
    %6 = arith.addf %4, %5 : vector<1x2048xf32>
    %c0_2 = arith.constant 0 : index
    %c0_3 = arith.constant 0 : index
    %7 = vector.load %arg3[%c0_2, %c0_3] : memref<1x2048xf32, #tpu.memory_space<vmem>>, vector<1x2048xf32>
    tpu.vector_store %arg3[%c0_2, %c0_3], %6 {strides = array<i32>} : memref<1x2048xf32, #tpu.memory_space<vmem>>, vector<1x2048xf32>,
    return
  }
  func.func @transform_0(%arg0: i32) -> i32 {
    %c0_i32 = arith.constant 0 : i32
    %c0_i32_0 = arith.constant 0 : i32
    return %c0_i32 : i32
  }
  func.func @transform_1(%arg0: i32) -> (i32, i32) {
    %c0_i32 = arith.constant 0 : i32
    %c0_i32_0 = arith.constant 0 : i32
    return %arg0, %c0_i32 : i32, i32
  }
  func.func @transform_2(%arg0: i32) -> (i32, i32) {
    %c0_i32 = arith.constant 0 : i32
    %c0_i32_0 = arith.constant 0 : i32
    return %arg0, %c0_i32 : i32, i32
  }
}

</mosaic_0001>

<bundles_post_ra>
// kernel: tpu_custom_call.1
= control target key start
LH: loop header
LB: loop body
LE: loop exit
PB: predicated region body
PF: predicated region fallthrough
CT: control target
= control target key end

     0   :  { %7 = vsyncpa [#allocation5], 0  ;;  %s148_s0 = inlined_call_operand.hbm [shape: f32[2], index: 0, kind: input, shape index: {}]   ;;  %s149_s1 = inlined_call_operand.hbm [shape: f32[1,2048], index: 1, kind: input, shape index: {}]   ;;  %s150_s2 = inlined_call_operand.hbm [shape: f32[1,2048], index: 2, kind: output, shape index: {}]  }
   0x1   :  { %8 = vsyncpa [#allocation3], 0 }
   0x2   :  { %9 = vsyncpa [#allocation4], 0  ;;  %s121_s9 = smov [#allocation2]   ;;  %s122_s12 = smov [#allocation6]  }
   0x3   :  { %17 = dma.hbm_to_smem %s148_s0, 16, %s121_s9, [#allocation5]  }
   0x4   :  { %s24_s13 = sshll.u32 %s122_s12, 4  ;;  %s25_s13 = int_to_ptr.vmem [resolvable:$true] %s24_s13 }
   0x5   :  { %s83_s14 = scalar_lea.vmem %s25_s13, 256  ;;  %p88_p1 = scmp.lt.s32.totalorder %s25_s13, %s25_s13 }
   0x6   :  { %p84_p0 = scmp.ne.s32.totalorder %s25_s13, %s83_s14  ;;  %p89_p2 = scmp.lt.s32.totalorder %s83_s14, %s83_s14 }
   0x8   :  { %p90_p3 = por %p89_p2, %p88_p1 }
   0xa   :  { %p91_p4 = pnand %p90_p3, %p84_p0 }
   0xc   :  { %94 = shalt.err (!%p91_p4)
}
   0xd   :  { %27 = dma.hbm_to_vmem [thread:$0]  %s149_s1, 256, %s25_s13, [#allocation3]  }
   0xe   :  { %115 = dma.done.wait [#allocation5], 16  }
   0xf   :  { %116 = vsyncadd [#allocation5], 4294967280 }
  0x10   :  { %117 = dma.done.wait [#allocation3], 256  }
  0x11   :  { %118 = vsyncadd [#allocation3], 4294967040 }
  0x12   :  { %34 = sfence }
  0x13   :  { %s35_s0 = sld [smem:[#allocation2]]  ;;  %v37_v0 = vld [vmem:[#allocation6] sm:$0xff]  ;;  %v38_v1 = vld [vmem:[#allocation6 + $0x8] sm:$0xff]  ;;  %s123_s18 = smov [#allocation7]  }
  0x14   :  { %s63_s17 = sld [smem:[#allocation2 + $0x1]]  ;;  %s53_s19 = sshll.u32 %s123_s18, 4  ;;  %s54_s19 = int_to_ptr.vmem [resolvable:$true] %s53_s19 }
  0x15   :  { %s95_s1 = scalar_lea.vmem %s54_s19, 256  ;;  %p100_p6 = scmp.lt.s32.totalorder %s54_s19, %s54_s19 }
  0x16   :  { %p96_p5 = scmp.ne.s32.totalorder %s54_s19, %s95_s1  ;;  %p101_p7 = scmp.lt.s32.totalorder %s95_s1, %s95_s1 }
  0x18   :  { %p102_p8 = por %p101_p7, %p100_p6 }
  0x19   :  { %v39_v2 = vstv %s35_s0 }
  0x1a   :  { %v40_v3 = vmul.f32 %v39_v2, %v37_v0  ;;  %v42_v4 = vstv %s63_s17  ;;  %v41_v5 = vmul.f32 %v39_v2, %v38_v1  ;;  %p103_p9 = pnand %p102_p8, %p96_p5 }
  0x1c   :  { %v43_v6 = vadd.f32 %v42_v4, %v40_v3  ;;  %v44_v7 = vadd.f32 %v42_v4, %v41_v5 }
  0x1e   :  { %45 = vst [vmem:[#allocation7] sm:$0xff] %v43_v6  ;;  %46 = vst [vmem:[#allocation7 + $0x8] sm:$0xff] %v44_v7 }
  0x1f   :  { %106 = shalt.err (!%p103_p9)
}
  0x20   :  { %56 = dma.vmem_to_hbm [thread:$0]  %s54_s19, 256, %s150_s2, [#allocation4]  }
  0x21   :  { %119 = dma.done.wait [#allocation4], 256  }
  0x22   :  { %120 = vsyncadd [#allocation4], 4294967040 }
  0x23   :  { %60 = vsyncpa [#allocation3], 1 }
  0x24   :  { %61 = vsyncpa [#allocation4], 1 }
  0x25   :  { %62 = vsyncpa [#allocation5], 1 }

</bundles_post_ra>
